<compile_context>
chip_gen: v5e
topology: v5e:2x2
jax: 0.10.0
libtpu: 0.0.40
codegen_flags: <defaults>
</compile_context>

<pallas_src>
import jax
import jax.numpy as jnp
from jax.experimental import pallas as pl
from jax.experimental.pallas import tpu as pltpu


def _linear_sigmoid_kernel(w_ref, b_ref, x_ref, o_ref):
    # w_ref: SMEM (OUT*IN,) f32  (row-major flatten of torch-style (OUT, IN))
    # b_ref: SMEM (OUT,)    f32
    # x_ref: VMEM (IN, TR, 128)  input dtype (f32 or bf16)
    # o_ref: VMEM (OUT, TR, 128) f32
    n_in = x_ref.shape[0]
    n_out = o_ref.shape[0]

    # Load each feature slab once as a dense (TR, 128) slab (all 8 sublanes of
    # every vreg used).  The upcast is a no-op for f32 inputs and keeps v5e's
    # VPU (no bf16 ALU) correct for bf16 inputs.
    xs = [x_ref[k].astype(jnp.float32) for k in range(n_in)]

    for j in range(n_out):
        # Pure-VPU contraction: IN scalar-broadcast muls + adds per output
        # feature, weights read as scalars straight from SMEM.
        y = xs[0] * w_ref[j * n_in + 0]
        for k in range(1, n_in):
            y = y + xs[k] * w_ref[j * n_in + k]
        y = y + b_ref[j]
        # jax.nn.sigmoid keeps full f32 accuracy; its exp runs on the EUP.
        # (If profiling ever shows VALU as the binding slot, switch the divide
        #  to pl.reciprocal(1.0 + jnp.exp(-y), approx=True).)
        o_ref[j] = jax.nn.sigmoid(y)


def _round_up(n, m):
    return ((n + m - 1) // m) * m


def linear_sigmoid_feature_major(x_fm, weight, bias, *, max_rows_per_block=2048):
    """Performance path (no relayouts).

    x_fm:   (IN, NR, 128) feature-major activations; batch = NR*128 samples,
            NR a multiple of 8 (pad samples are computed but simply ignored).
    weight: (OUT, IN), bias: (OUT,).
    Returns (OUT, NR, 128) float32 in the same feature-major layout.
    """
    IN, NR, L = x_fm.shape
    assert L == 128, "lane axis must be 128"
    assert NR % 8 == 0, "row axis must be a multiple of 8 (pad the batch)"
    OUT, IN_w = weight.shape
    assert IN == IN_w and bias.shape == (OUT,)

    # Tile choice: TR rows (multiple of 8) of 128 samples per grid step.
    #  * large enough to amortize per-step pipeline overhead (up to 256K
    #    samples / ~8 MiB double-buffered, safely inside scoped VMEM on
    #    v5e/v6e/v7x),
    #  * >= 2 steps once the batch is big enough so both v7x TCs get work,
    #  * ragged final block instead of padding B up to a multiple of the tile.
    grid_n = pl.cdiv(NR, max_rows_per_block)
    if NR >= 64:
        grid_n = max(grid_n, 2)
    tr = min(_round_up(pl.cdiv(NR, grid_n), 8), NR)
    grid_n = pl.cdiv(NR, tr)  # final block may be ragged; Pallas masks stores

    return pl.pallas_call(
        _linear_sigmoid_kernel,
        out_shape=jax.ShapeDtypeStruct((OUT, NR, 128), jnp.float32),
        grid=(grid_n,),
        in_specs=[
            # 4 scalars total: keep them in SMEM, read as scalars in-kernel.
            pl.BlockSpec(memory_space=pltpu.MemorySpace.SMEM),  # weight (OUT*IN,)
            pl.BlockSpec(memory_space=pltpu.MemorySpace.SMEM),  # bias   (OUT,)
            pl.BlockSpec((IN, tr, 128), lambda i: (0, i, 0)),
        ],
        out_specs=pl.BlockSpec((OUT, tr, 128), lambda i: (0, i, 0)),
        compiler_params=pltpu.CompilerParams(
            dimension_semantics=("parallel",),
        ),
    )(weight.reshape(OUT * IN).astype(jnp.float32),
      bias.reshape(OUT).astype(jnp.float32),
      x_fm)


def linear_sigmoid(x, weight, bias):
    """Torch-convention wrapper: x (B, IN) -> (B, OUT) f32.

    NOTE: the feature-major relayout and the epilogue slice+transpose below
    roughly triple HBM traffic for this bandwidth-bound op.  Producers /
    consumers that can work in the feature-major (IN, B/128, 128) layout
    should call linear_sigmoid_feature_major directly.
    TODO(synk): fuse this relayout into the upstream activation producer.
    """
    B, IN = x.shape
    OUT = weight.shape[0]
    # Pad only to a multiple of 1024 samples (8 sublanes x 128 lanes), NOT to
    # a multiple of the (large) batch tile.
    b_pad = _round_up(B, 1024)
    nr = b_pad // 128
    x_fm = jnp.pad(x, ((0, b_pad - B), (0, 0))).T.reshape(IN, nr, 128)
    out_fm = linear_sigmoid_feature_major(x_fm, weight, bias)
    return out_fm.reshape(OUT, b_pad)[:, :B].T


if __name__ == "__main__":
    key = jax.random.PRNGKey(0)
    kx, kw, kb, kx2 = jax.random.split(key, 4)

    B, IN, OUT = 8, 3, 1  # Linear(3, 1, bias=True), as in the torch module

    # Deterministic parameter init (synthetic; mirrors torch.nn.Linear shapes).
    bound = 1.0 / (IN ** 0.5)
    weight = jax.random.uniform(kw, (OUT, IN), jnp.float32, -bound, bound)
    bias = jax.random.uniform(kb, (OUT,), jnp.float32, -bound, bound)

    x = jax.random.normal(kx, (B, IN), jnp.float32)

    out = linear_sigmoid(x, weight, bias)
    out = jax.block_until_ready(out)

    # Sanity check against a pure-JAX reference.
    ref = jax.nn.sigmoid(x @ weight.T + bias.reshape(1, OUT))
    assert out.shape == (B, OUT)
    assert jnp.allclose(out, ref, atol=1e-5), "mismatch vs reference (B=8)"

    # Second check: batch large enough to exercise the multi-step grid and the
    # ragged final block (B=8200 -> 72 rows -> 2 grid steps of 40 rows).
    B2 = 8200
    x2 = jax.random.normal(kx2, (B2, IN), jnp.float32)
    out2 = jax.block_until_ready(linear_sigmoid(x2, weight, bias))
    ref2 = jax.nn.sigmoid(x2 @ weight.T + bias.reshape(1, OUT))
    assert out2.shape == (B2, OUT)
    assert jnp.allclose(out2, ref2, atol=1e-5), "mismatch vs reference (B=8200)"

    print("KERNEL_OK")
</pallas_src>

<mosaic_0001>
module attributes {stable_mosaic.version = 11 : i64} {
  func.func @_linear_sigmoid_kernel(%arg0: i32, %arg1: memref<3xf32, #tpu.memory_space<smem>>, %arg2: memref<1xf32, #tpu.memory_space<smem>>, %arg3: memref<3x8x128xf32, #tpu.memory_space<vmem>>, %arg4: memref<1x8x128xf32, #tpu.memory_space<vmem>>) attributes {dimension_semantics = [#tpu.dimension_semantics<parallel>], iteration_bounds = array<i64: 1>, scalar_prefetch = 0 : i64, scratch_operands = 0 : i64, tpu.core_type = #tpu.core_type<tc>, window_params = [{transform_indices = @transform_0, window_bounds = array<i64: 3>}, {transform_indices = @transform_1, window_bounds = array<i64: 1>}, {transform_indices = @transform_2, window_bounds = array<i64: 3, 8, 128>}, {transform_indices = @transform_3, window_bounds = array<i64: 1, 8, 128>}]} {
    %c0 = arith.constant 0 : index
    %c0_0 = arith.constant 0 : index
    %c0_1 = arith.constant 0 : index
    %0 = vector.load %arg3[%c0, %c0_0, %c0_1] : memref<3x8x128xf32, #tpu.memory_space<vmem>>, vector<1x8x128xf32>
    %1 = vector.shape_cast %0 : vector<1x8x128xf32> to vector<8x128xf32>
    %c1 = arith.constant 1 : index
    %c0_2 = arith.constant 0 : index
    %c0_3 = arith.constant 0 : index
    %2 = vector.load %arg3[%c1, %c0_2, %c0_3] : memref<3x8x128xf32, #tpu.memory_space<vmem>>, vector<1x8x128xf32>
    %3 = vector.shape_cast %2 : vector<1x8x128xf32> to vector<8x128xf32>
    %c2 = arith.constant 2 : index
    %c0_4 = arith.constant 0 : index
    %c0_5 = arith.constant 0 : index
    %4 = vector.load %arg3[%c2, %c0_4, %c0_5] : memref<3x8x128xf32, #tpu.memory_space<vmem>>, vector<1x8x128xf32>
    %5 = vector.shape_cast %4 : vector<1x8x128xf32> to vector<8x128xf32>
    %c0_6 = arith.constant 0 : index
    %6 = memref.load %arg1[%c0_6] : memref<3xf32, #tpu.memory_space<smem>>
    %7 = vector.broadcast %6 : f32 to vector<8x128xf32>
    %8 = arith.mulf %1, %7 : vector<8x128xf32>
    %c1_7 = arith.constant 1 : index
    %9 = memref.load %arg1[%c1_7] : memref<3xf32, #tpu.memory_space<smem>>
    %10 = vector.broadcast %9 : f32 to vector<8x128xf32>
    %11 = arith.mulf %3, %10 : vector<8x128xf32>
    %12 = arith.addf %8, %11 : vector<8x128xf32>
    %c2_8 = arith.constant 2 : index
    %13 = memref.load %arg1[%c2_8] : memref<3xf32, #tpu.memory_space<smem>>
    %14 = vector.broadcast %13 : f32 to vector<8x128xf32>
    %15 = arith.mulf %5, %14 : vector<8x128xf32>
    %16 = arith.addf %12, %15 : vector<8x128xf32>
    %c0_9 = arith.constant 0 : index
    %17 = memref.load %arg2[%c0_9] : memref<1xf32, #tpu.memory_space<smem>>
    %18 = vector.broadcast %17 : f32 to vector<8x128xf32>
    %19 = arith.addf %16, %18 : vector<8x128xf32>
    %20 = arith.negf %19 : vector<8x128xf32>
    %21 = math.exp %20 : vector<8x128xf32>
    %cst = arith.constant 1.000000e+00 : f32
    %22 = vector.broadcast %cst : f32 to vector<8x128xf32>
    %23 = arith.addf %22, %21 : vector<8x128xf32>
    %24 = arith.divf %22, %23 : vector<8x128xf32>
    %c0_10 = arith.constant 0 : index
    %c0_11 = arith.constant 0 : index
    %c0_12 = arith.constant 0 : index
    %25 = vector.load %arg4[%c0_10, %c0_11, %c0_12] : memref<1x8x128xf32, #tpu.memory_space<vmem>>, vector<1x8x128xf32>
    %26 = vector.shape_cast %25 : vector<1x8x128xf32> to vector<8x128xf32>
    %27 = vector.shape_cast %24 : vector<8x128xf32> to vector<1x8x128xf32>
    tpu.vector_store %arg4[%c0_10, %c0_11, %c0_12], %27 {strides = array<i32>} : memref<1x8x128xf32, #tpu.memory_space<vmem>>, vector<1x8x128xf32>,
    return
  }
  func.func @transform_0(%arg0: i32) -> i32 {
    %c0_i32 = arith.constant 0 : i32
    %c0_i32_0 = arith.constant 0 : i32
    return %c0_i32 : i32
  }
  func.func @transform_1(%arg0: i32) -> i32 {
    %c0_i32 = arith.constant 0 : i32
    %c0_i32_0 = arith.constant 0 : i32
    return %c0_i32 : i32
  }
  func.func @transform_2(%arg0: i32) -> (i32, i32, i32) {
    %c0_i32 = arith.constant 0 : i32
    %c0_i32_0 = arith.constant 0 : i32
    %c0_i32_1 = arith.constant 0 : i32
    return %c0_i32, %arg0, %c0_i32_0 : i32, i32, i32
  }
  func.func @transform_3(%arg0: i32) -> (i32, i32, i32) {
    %c0_i32 = arith.constant 0 : i32
    %c0_i32_0 = arith.constant 0 : i32
    %c0_i32_1 = arith.constant 0 : i32
    return %c0_i32, %arg0, %c0_i32_0 : i32, i32, i32
  }
}

</mosaic_0001>

<bundles_post_ra>
// kernel: tpu_custom_call.1
= control target key start
LH: loop header
LB: loop body
LE: loop exit
PB: predicated region body
PF: predicated region fallthrough
CT: control target
= control target key end

     0   :  { %9 = vsyncpa [#allocation6], 0  ;;  %s217_s0 = inlined_call_operand.vmem [shape: f32[3], index: 0, kind: input, shape index: {}]   ;;  %s218_s1 = inlined_call_operand.<no memory space> [shape: f32[1], index: 1, kind: input, shape index: {}]   ;;  %s219_s2 = inlined_call_operand.hbm [shape: f32[3,8,128], index: 2, kind: input, shape index: {}]   ;;  %s220_s3 = inlined_call_operand.hbm [shape: f32[1,8,128], index: 3, kind: output, shape index: {}]  }
   0x1   :  { %10 = vsyncpa [#allocation4], 0 }
   0x2   :  { %11 = vsyncpa [#allocation5], 0  ;;  %s17_s14 = sshll.u32 %s217_s0, 4  ;;  %s27_s17 = sshll.u32 %s219_s2, 4  ;;  %s18_s14 = int_to_ptr.vmem [resolvable:$true] %s17_s14  ;;  %s28_s17 = int_to_ptr.hbm [resolvable:$true] %s27_s17 }
   0x3   :  { %s180_s18 = smov [#allocation3]   ;;  %s181_s19 = smov [#allocation7]  }
   0x4   :  { %20 = dma.vmem_to_smem %s18_s14, 16, %s180_s18, [#allocation6]  }
   0x5   :  { %s29_s20 = sshll.u32 %s181_s19, 4  ;;  %s182_s21 = smov 128   ;;  %s30_s20 = int_to_ptr.vmem [resolvable:$true] %s29_s20 }
   0x6   :  { %s183_s22 = smov 8  }
   0x7   :  { %35 = dma.hbm_to_vmem [thread:$0]  %s28_s17, 384, %s30_s20, [#allocation4], %s182_s21, %s182_s21, %s183_s22  }
   0x8   :  { %174 = dma.done.wait [#allocation6], 16  }
   0x9   :  { %175 = vsyncadd [#allocation6], 4294967280 }
   0xa   :  { %176 = dma.done.wait [#allocation4], 384  }
   0xb   :  { %177 = vsyncadd [#allocation4], 4294966912 }
   0xc   :  { %44 = sfence }
   0xd   :  { %s50_s0 = sld [smem:[#allocation3]]  ;;  %v45_v0 = vld [vmem:[#allocation7] sm:$0xff]  ;;  %v47_v1 = vld [vmem:[#allocation7 + $0x8] sm:$0xff]  ;;  %v49_v2 = vld [vmem:[#allocation7 + $0x10] sm:$0xff]  ;;  %v62_v10 = vstv %s218_s1  ;;  %s184_s26 = smov [#allocation8]  }
   0xe   :  { %s102_s23 = sld [smem:[#allocation3 + $0x1]]  ;;  %s89_s27 = sshll.u32 %s184_s26, 4  ;;  %s90_s27 = int_to_ptr.vmem [resolvable:$true] %s89_s27 }
   0xf   :  { %s103_s24 = sld [smem:[#allocation3 + $0x2]]  ;;  %s91_s29 = sshll.u32 %s220_s3, 4  ;;  %s92_s29 = int_to_ptr.hbm [resolvable:$true] %s91_s29 }
  0x13   :  { %v51_v3 = vstv %s50_s0 }
  0x14   :  { %v52_v4 = vmul.f32 %v51_v3, %v45_v0  ;;  %v54_v5 = vstv %s102_s23 }
  0x15   :  { %v55_v6 = vmul.f32 %v54_v5, %v47_v1  ;;  %v58_v7 = vstv %s103_s24 }
  0x16   :  { %v59_v8 = vmul.f32 %v58_v7, %v49_v2 }
  0x17   :  { %v56_v9 = vadd.f32 %v55_v6, %v52_v4 }
  0x19   :  { %v60_v11 = vadd.f32 %v59_v8, %v56_v9 }
  0x1b   :  { %v63_v12 = vadd.f32 %v62_v10, %v60_v11 }
  0x1d   :  { %v104_v13 = vmul.f32 -1.442695, %v63_v12 }
  0x1f   :  { %110 = vpow2.f32 %v104_v13 }
  0x25   :  { %v111_v14 = vpop.eup %110 }
  0x26   :  { %v67_v15 = vadd.f32 1.0, %v111_v14 }
  0x28   :  { %112 = vrcp.f32 %v67_v15  ;;  %v79_v18 = vand.u32 2147483648, %v67_v15  ;;  %vm73_vm0 = vweird.f32 %v67_v15  ;;  %v77_v20 = vand.u32 2147483647, %v67_v15 }
  0x2a   :  { %v80_v22 = vor.u32 1.1754944e-38, %v79_v18  ;;  %vm78_vm3 = vcmp.eq.f32.partialorder %v77_v20, 8.507059e+37 }
  0x2e   :  { %v113_v16 = vpop.eup %112 }
  0x2f   :  { %v69_v17 = vmul.f32 %v113_v16, %v67_v15  ;;  %vm74_vm1 = vweird.f32 %v113_v16 }
  0x30   :  { %vm75_vm2 = vmor %vm73_vm0, %vm74_vm1 }
  0x31   :  { %v70_v19 = vsub.f32 1.0, %v69_v17 }
  0x33   :  { %v71_v21 = vmul.f32 %v113_v16, %v70_v19 }
  0x35   :  { %v72_v23 = vadd.f32 %v113_v16, %v71_v21 }
  0x37   :  { %v76_v24 = vsel %vm75_vm2, %v113_v16, %v72_v23 }
  0x38   :  { %v81_v25 = vsel %vm78_vm3, %v80_v22, %v76_v24 }
  0x39   :  { %83 = vst [vmem:[#allocation8] sm:$0xff] %v81_v25 }
  0x3a   :  { %94 = dma.vmem_to_hbm [thread:$0]  %s90_s27, 128, %s92_s29, [#allocation5]  }
  0x3b   :  { %178 = dma.done.wait [#allocation5], 128  }
  0x3c   :  { %179 = vsyncadd [#allocation5], 4294967168 }
  0x3d   :  { %99 = vsyncpa [#allocation4], 1 }
  0x3e   :  { %100 = vsyncpa [#allocation5], 1 }
  0x3f   :  { %101 = vsyncpa [#allocation6], 1 }

</bundles_post_ra>
